<compile_context>
chip_gen: v6e
topology: v6e:2x2x1
jax: 0.10.0
libtpu: 0.0.40
codegen_flags: <defaults>
</compile_context>

<pallas_src>
import numpy as np
import jax
import jax.numpy as jnp
from jax.experimental import pallas as pl
from jax.experimental.pallas import tpu as pltpu


# ---------------------------------------------------------------------------
# Deterministic sinusoidal position embedding (same math as the PyTorch code).
# This is a constant parameter; it is built host-side, not inside the kernel.
# ---------------------------------------------------------------------------
def position_embedding(seq_len: int, emb_size: int) -> jnp.ndarray:
    pe = np.ones((seq_len, emb_size), dtype=np.float32)
    for i in range(seq_len):
        for j in range(emb_size):
            if j % 2 == 0:
                pe[i, j] = np.sin(i / pow(10000, j / emb_size))
            else:
                pe[i, j] = np.cos(i / pow(10000, (j - 1) / emb_size))
    return jnp.asarray(pe)


def _round_up(x: int, m: int) -> int:
    return ((x + m - 1) // m) * m


# ---------------------------------------------------------------------------
# Pallas kernel: one seq-tile of one batch element.
#   patches_ref: (ts, K)  mxu dtype     w_ref: (K, E)  mxu dtype
#   pos_ref:     (ts, E)  f32 (bias + pos, cls row folded in)
#   out_ref:     (ts, E)  f32
# ---------------------------------------------------------------------------
def patch_embed_kernel(patches_ref, w_ref, pos_ref, out_ref):
    proj = jnp.dot(patches_ref[...], w_ref[...],
                   preferred_element_type=jnp.float32)          # MXU, f32 acc
    out_ref[...] = (proj + pos_ref[...]).astype(out_ref.dtype)  # f32 VPU add


def patch_embedding_forward(x, conv_w, conv_b, cls_token, pos_embed,
                            patch_size: int, *, tile_s: int = 512,
                            mxu_dtype=jnp.bfloat16):
    """x: (B, C, H, W) float32 -> (B, num_patches + 1, emb_size) float32."""
    B, C, H, W = x.shape
    E = conv_w.shape[0]
    ph, pw = H // patch_size, W // patch_size
    P = ph * pw
    K = C * patch_size * patch_size
    S = P + 1                                   # cls row + patches
    f32 = jnp.float32

    # --- seq tiling: one tile if it fits, otherwise 8-aligned tiles ---------
    tile_s = max(8, (int(tile_s) // 8) * 8)
    if S <= tile_s:
        ts, S_pad = S, S                        # block dim == full dim: legal
    else:
        ts = tile_s
        S_pad = _round_up(S, ts)

    # --- staged patch slab: (B, S_pad, K), row 0 per batch is a zero row so
    #     proj there is 0 and the pos row carries cls + pos[0]. --------------
    patches = x.reshape(B, C, ph, patch_size, pw, patch_size)
    patches = patches.transpose(0, 2, 4, 1, 3, 5).reshape(B, P, K)
    patches_s = jnp.pad(patches, ((0, 0), (1, S_pad - S), (0, 0))
                        ).astype(mxu_dtype)     # single pad pass, no K padding

    # conv weight (E, C, kh, kw) -> (K, E) so that patch @ W == conv output
    w_kE = conv_w.reshape(E, K).T.astype(mxu_dtype)

    # pos + bias rows (f32, tiny): row 0 = cls + pos[0] (no conv bias),
    # rows 1..P = pos[r] + conv bias, padded rows (if any) = 0.
    cls_row = cls_token.reshape(1, E).astype(f32) + pos_embed[0:1, :].astype(f32)
    body_rows = pos_embed[1:, :].astype(f32) + conv_b.astype(f32)[None, :]
    posbias = jnp.concatenate([cls_row, body_rows], axis=0)       # (S, E)
    if S_pad != S:
        posbias = jnp.pad(posbias, ((0, S_pad - S), (0, 0)))

    # --- explicit VMEM budget: double-buffered tiles + weight, with (8,128)
    #     vreg padding accounted for. Covers v5e (16 MiB scoped default) and
    #     v7x (64 MiB physical / 32 MiB scoped). --------------------------
    mxu_b = jnp.dtype(mxu_dtype).itemsize
    tsv, Kv, Ev = _round_up(ts, 8), _round_up(K, 128), _round_up(E, 128)
    need = 2 * (tsv * Kv * mxu_b            # patches tile (double-buffered)
                + 2 * tsv * Ev * 4          # pos tile + out tile (f32)
                + _round_up(K, 16) * Ev * mxu_b)  # weight (invariant)
    vmem_bytes = int(min(100 * 2**20, max(8 * 2**20, 2 * need)))

    out = pl.pallas_call(
        patch_embed_kernel,
        out_shape=jax.ShapeDtypeStruct((B, S_pad, E), f32),
        grid_spec=pltpu.PrefetchScalarGridSpec(
            num_scalar_prefetch=0,
            grid=(S_pad // ts, B),                      # inner axis = batch
            in_specs=[
                # patches tile: varies with both axes
                pl.BlockSpec((None, ts, K), lambda i, b: (b, i, 0)),
                # weight: grid-invariant, fetched once
                pl.BlockSpec((K, E), lambda i, b: (0, 0)),
                # pos+bias tile: ignores batch axis -> no re-DMA across b
                pl.BlockSpec((ts, E), lambda i, b: (i, 0)),
            ],
            out_specs=pl.BlockSpec((None, ts, E), lambda i, b: (b, i, 0)),
        ),
        compiler_params=pltpu.CompilerParams(
            dimension_semantics=("parallel", "parallel"),
            vmem_limit_bytes=vmem_bytes),
    )(patches_s, w_kE, posbias)

    # Final shape already includes the cls row; slice only if seq was padded.
    return out if S_pad == S else out[:, :S, :]


# ---------------------------------------------------------------------------
# Pure-JAX reference for correctness checking.
# operand_dtype lets us compare against a reference using the same MXU operand
# precision as the kernel (f32 accumulation either way).
# ---------------------------------------------------------------------------
def reference_forward(x, conv_w, conv_b, cls_token, pos_embed, patch_size,
                      operand_dtype=jnp.float32):
    B, C, H, W = x.shape
    E = conv_w.shape[0]
    ph, pw = H // patch_size, W // patch_size
    P, K = ph * pw, C * patch_size * patch_size
    patches = x.reshape(B, C, ph, patch_size, pw, patch_size)
    patches = patches.transpose(0, 2, 4, 1, 3, 5).reshape(B, P, K)
    proj = jnp.dot(patches.astype(operand_dtype),
                   conv_w.reshape(E, K).T.astype(operand_dtype),
                   preferred_element_type=jnp.float32)
    proj = proj + conv_b[None, None, :]
    cls = jnp.broadcast_to(cls_token.reshape(1, 1, E), (B, 1, E)).astype(jnp.float32)
    return jnp.concatenate([cls, proj], axis=1) + pos_embed[None, :, :]


if __name__ == "__main__":
    # Small shapes consistent with the module: batch=2, channels=4, img=16,
    # patch=2, emb=32  ->  64 patches, seq = 65, K = 16.
    in_channels, patch_size, emb_size, img_size = 4, 2, 32, 16
    batch = 2
    num_patches = (img_size // patch_size) ** 2

    key = jax.random.PRNGKey(0)
    k_x, k_w, k_b, k_cls = jax.random.split(key, 4)

    x = jax.random.normal(k_x, (batch, in_channels, img_size, img_size),
                          dtype=jnp.float32)
    conv_w = jax.random.normal(
        k_w, (emb_size, in_channels, patch_size, patch_size),
        dtype=jnp.float32) * 0.1
    conv_b = jax.random.normal(k_b, (emb_size,), dtype=jnp.float32) * 0.1
    cls_token = jax.random.uniform(k_cls, (1, 1, emb_size), dtype=jnp.float32)
    pos_embed = position_embedding(num_patches + 1, emb_size)

    out = patch_embedding_forward(x, conv_w, conv_b, cls_token, pos_embed,
                                  patch_size)
    out = jax.block_until_ready(out)
    assert out.shape == (batch, num_patches + 1, emb_size)

    # Tight check against a reference with matching (bf16) MXU operands.
    ref_bf16 = reference_forward(x, conv_w, conv_b, cls_token, pos_embed,
                                 patch_size, operand_dtype=jnp.bfloat16)
    np.testing.assert_allclose(np.asarray(out), np.asarray(ref_bf16),
                               rtol=1e-4, atol=1e-4)

    # Loose sanity check against the exact f32 reference semantics.
    ref_f32 = reference_forward(x, conv_w, conv_b, cls_token, pos_embed,
                                patch_size)
    np.testing.assert_allclose(np.asarray(out), np.asarray(ref_f32),
                               rtol=3e-2, atol=3e-2)

    print("KERNEL_OK")
</pallas_src>

<mosaic_0001>
module attributes {stable_mosaic.version = 11 : i64} {
  func.func @patch_embed_kernel(%arg0: i32, %arg1: i32, %arg2: memref<1x65x16xbf16, #tpu.memory_space<vmem>>, %arg3: memref<16x32xbf16, #tpu.memory_space<vmem>>, %arg4: memref<65x32xf32, #tpu.memory_space<vmem>>, %arg5: memref<1x65x32xf32, #tpu.memory_space<vmem>>) attributes {dimension_semantics = [#tpu.dimension_semantics<parallel>, #tpu.dimension_semantics<parallel>], iteration_bounds = array<i64: 1, 2>, scalar_prefetch = 0 : i64, scratch_operands = 0 : i64, tpu.core_type = #tpu.core_type<tc>, window_params = [{transform_indices = @transform_0, window_bounds = array<i64: 1, 65, 16>}, {pipeline_mode = #tpu.pipeline_mode<synchronous>, transform_indices = @transform_1, window_bounds = array<i64: 16, 32>}, {transform_indices = @transform_2, window_bounds = array<i64: 65, 32>}, {transform_indices = @transform_3, window_bounds = array<i64: 1, 65, 32>}]} {
    %c0 = arith.constant 0 : index
    %c0_0 = arith.constant 0 : index
    %c0_1 = arith.constant 0 : index
    %0 = vector.load %arg2[%c0, %c0_0, %c0_1] : memref<1x65x16xbf16, #tpu.memory_space<vmem>>, vector<1x65x16xbf16>
    %1 = vector.shape_cast %0 : vector<1x65x16xbf16> to vector<65x16xbf16>
    %c0_2 = arith.constant 0 : index
    %c0_3 = arith.constant 0 : index
    %2 = vector.load %arg3[%c0_2, %c0_3] : memref<16x32xbf16, #tpu.memory_space<vmem>>, vector<16x32xbf16>
    %cst = arith.constant dense<0.000000e+00> : vector<65x32xf32>
    %3 = tpu.matmul %1, %2, %cst {dimension_numbers = #tpu.dot_dimension_numbers<[1], [0], [0], [1], [0, 0, 1, 1], [], []>} : vector<65x16xbf16>, vector<16x32xbf16>, vector<65x32xf32> -> vector<65x32xf32>
    %c0_4 = arith.constant 0 : index
    %c0_5 = arith.constant 0 : index
    %4 = vector.load %arg4[%c0_4, %c0_5] : memref<65x32xf32, #tpu.memory_space<vmem>>, vector<65x32xf32>
    %5 = arith.addf %3, %4 : vector<65x32xf32>
    %c0_6 = arith.constant 0 : index
    %c0_7 = arith.constant 0 : index
    %c0_8 = arith.constant 0 : index
    %6 = vector.load %arg5[%c0_6, %c0_7, %c0_8] : memref<1x65x32xf32, #tpu.memory_space<vmem>>, vector<1x65x32xf32>
    %7 = vector.shape_cast %6 : vector<1x65x32xf32> to vector<65x32xf32>
    %8 = vector.shape_cast %5 : vector<65x32xf32> to vector<1x65x32xf32>
    tpu.vector_store %arg5[%c0_6, %c0_7, %c0_8], %8 {strides = array<i32>} : memref<1x65x32xf32, #tpu.memory_space<vmem>>, vector<1x65x32xf32>,
    return
  }
  func.func @transform_0(%arg0: i32, %arg1: i32) -> (i32, i32, i32) {
    %c0_i32 = arith.constant 0 : i32
    %c0_i32_0 = arith.constant 0 : i32
    return %arg1, %arg0, %c0_i32 : i32, i32, i32
  }
  func.func @transform_1(%arg0: i32, %arg1: i32) -> (i32, i32) {
    %c0_i32 = arith.constant 0 : i32
    %c0_i32_0 = arith.constant 0 : i32
    %c0_i32_1 = arith.constant 0 : i32
    return %c0_i32, %c0_i32_0 : i32, i32
  }
  func.func @transform_2(%arg0: i32, %arg1: i32) -> (i32, i32) {
    %c0_i32 = arith.constant 0 : i32
    %c0_i32_0 = arith.constant 0 : i32
    return %arg0, %c0_i32 : i32, i32
  }
  func.func @transform_3(%arg0: i32, %arg1: i32) -> (i32, i32, i32) {
    %c0_i32 = arith.constant 0 : i32
    %c0_i32_0 = arith.constant 0 : i32
    return %arg1, %arg0, %c0_i32 : i32, i32, i32
  }
}

</mosaic_0001>

<bundles_post_ra>
// kernel: tpu_custom_call.1
= control target key start
LH: loop header
LB: loop body
LE: loop exit
PB: predicated region body
PF: predicated region fallthrough
CT: control target
= control target key end

     0   :  { %s614_s12 = smov 0   ;;  %s616_s13 = smov 0   ;;  %s701_s0 = inlined_call_operand.vmem [shape: bf16[2,65,16], index: 0, kind: input, shape index: {}]   ;;  %s702_s1 = inlined_call_operand.vmem [shape: bf16[16,32], index: 1, kind: input, shape index: {}]   ;;  %s703_s2 = inlined_call_operand.vmem [shape: f32[65,32], index: 2, kind: input, shape index: {}]   ;;  %s704_s3 = inlined_call_operand.vmem [shape: f32[2,65,32], index: 3, kind: output, shape index: {}]  }
   0x1   :  { %s618_s14 = smov 0  }
   0x2 LB: > { %s22_s15 = sadd.s32 1, %s586_s13  ;;  %p488_p0 = scmp.ge.s32.totalorder %s590_s14, 1  ;;  %s590_s14 = sphi %s618_s14, %s13_s14   ;;  %s586_s13 = sphi %s616_s13, %s706_s13   ;;  %s582_s12 = sphi %s614_s12, %s705_s12  }
   0x3   : > { %p23_p1 = scmp.ge.s32.totalorder %s22_s15, 2  ;;  %p169_p2 = scmp.lt.s32.totalorder %s590_s14, 3 }
   0x5   : > { %s708_s15 = smov (%p23_p1, %s22_s15), 0  ;;  %p170_p3 = pnand %p488_p0, %p169_p2 }
   0x6   : > { %p207_p4 = scmp.lt.s32.totalorder (!%p170_p3), %s582_s12, 1 }
   0x7   : > { %173 = sbr.rel (%p170_p3) target bundleno = 233 (0xe9), region = 32 }
   0xc   : > { %v562_v0 = vld [vmem:[%s702_s1] sm:$0xff]   ;;  %v592_v1 = vmov 0.0   ;;  %vm593_vm0 = vmmov 0   ;;  %s710_s12 = smov (!%p207_p4, %s582_s12), 1  ;;  %vm282_vm1 = vcmask 130048   ;;  %v250_v8 = vld [vmem:[%s703_s2 + $0x30] sm:$0xff] }
   0xd   : > { %510 = vmatprep.subr.bf16.mxu0 %v592_v1  ;;  %532 = vmatprep.subr.bf16.mxu1 %v592_v1  ;;  %s534_s18 = smul.u32 36, %s710_s12  ;;  %v244_v7 = vld [vmem:[%s703_s2] sm:$0xff]  ;;  %vm370_vm2 = vcmask 261120   ;;  %v245_v14 = vld [vmem:[%s703_s2 + $0x8] sm:$0xff]  ;;  %v251_v16 = vld [vmem:[%s703_s2 + $0x38] sm:$0xff]  ;;  %vm379_vm3 = vcmask 253952  }
   0xe   : > { %511 = vmatpush3.bf16.msra.mxu0 %v562_v0  ;;  %512 = vmatprep.mubr.msk.bf16.mxu0 %vm593_vm0, %v592_v1  ;;  %s535_s22 = smul.u32 72, %s710_s12  ;;  %v246_v22 = vld [vmem:[%s703_s2 + $0x10] sm:$0xff]  ;;  %v252_v24 = vld [vmem:[%s703_s2 + $0x40] sm:$0x1]  ;;  %v247_v30 = vld [vmem:[%s703_s2 + $0x18] sm:$0xff] }
   0xf   : > { %533 = vmatpush3.bf16.msra.mxu1 %v562_v0  ;;  %524 = vmatprep.mubr.msk.bf16.mxu1 %vm593_vm0, %v592_v1  ;;  %s214_s21 = scalar_lea.vmem %s701_s0, %s534_s18  ;;  %v248_v36 = vld [vmem:[%s703_s2 + $0x20] sm:$0xff]  ;;  %v249_v41 = vld [vmem:[%s703_s2 + $0x28] sm:$0xff] }
  0x10   : > { %v563_v2 = vld [vmem:[%s214_s21] sm:$0xff]   ;;  %v564_v3 = vld [vmem:[%s214_s21 + $0x18] sm:$0xff]   ;;  %v565_v4 = vld [vmem:[%s214_s21 + $0x8] sm:$0xff]   ;;  %s652_s29 = scalar_lea.vmem %s704_s3, %s535_s22 }
  0x11   : > { %513 = vmatmul.mubr.msk.bf16.vlgmr.msra.gmra.mxu0 %vm282_vm1, %v563_v2  ;;  %v566_v5 = vld [vmem:[%s214_s21 + $0x20] ss:$0 sps:$4 sm:$0x11]   ;;  %v567_v6 = vld [vmem:[%s214_s21 + $0x10] sm:$0xff]  }
  0x12   : > { %525 = vmatmul.mubr.msk.bf16.vlgmr.msra.gmra.mxu1 %vm282_vm1, %v564_v3  ;;  %516 = vmatprep.mubr.msk.bf16.mxu0 %vm593_vm0, %v592_v1 }
  0x13   : > { %528 = vmatprep.mubr.msk.bf16.mxu1 %vm593_vm0, %v592_v1 }
  0x19   : > { %517 = vmatmul.mubr.msk.bf16.gmra.mxu0 %vm282_vm1, %v565_v4 }
  0x1a   : > { %529 = vmatmul.mubr.msk.bf16.gmra.mxu1 %vm282_vm1, %v566_v5  ;;  %520 = vmatprep.mubr.msk.bf16.mxu0 %vm593_vm0, %v592_v1 }
  0x21   : > { %521 = vmatmul.mubr.msk.bf16.gmra.mxu0 %vm282_vm1, %v567_v6 }
  0xd1   : > { %v332_v9 = vpop.f32.mrf.mxu0 }
  0xd2   : > { %v333_v10 = vadd.f32 %v332_v9, %v244_v7  ;;  %v356_v11 = vpop.f32.mrf.mxu1 }
  0xd3   : > { %v514_v12 = vpop.f32.mrf.mxu0  ;;  %v357_v13 = vadd.f32 %v356_v11, %v250_v8 }
  0xd4   : > { %371 = vst.msk [vmem:[%s652_s29] sm:$0xff] %vm370_vm2, %v333_v10  ;;  %v526_v15 = vpop.f32.mrf.mxu1 }
  0xd5   : > { %377 = vst.msk [vmem:[%s652_s29 + $0x30] sm:$0xff] %vm370_vm2, %v357_v13  ;;  %v335_v17 = vpop.f32.mrf.mxu0 }
  0xd6   : > { %v336_v18 = vadd.f32 %v335_v17, %v245_v14  ;;  %v359_v19 = vpop.f32.mrf.mxu1 }
  0xd7   : > { %v515_v20 = vpop.f32.mrf.mxu0  ;;  %v360_v21 = vadd.f32 %v359_v19, %v251_v16 }
  0xd8   : > { %372 = vst.msk [vmem:[%s652_s29 + $0x8] sm:$0xff] %vm370_vm2, %v336_v18  ;;  %v527_v23 = vpop.f32.mrf.mxu1 }
  0xd9   : > { %378 = vst.msk [vmem:[%s652_s29 + $0x38] sm:$0xff] %vm370_vm2, %v360_v21  ;;  %v340_v25 = vpop.f32.mrf.mxu0 }
  0xda   : > { %v341_v26 = vadd.f32 %v340_v25, %v246_v22  ;;  %v364_v27 = vpop.f32.mrf.mxu1 }
  0xdb   : > { %v518_v28 = vpop.f32.mrf.mxu0  ;;  %v365_v29 = vadd.f32 %v364_v27, %v252_v24 }
  0xdc   : > { %373 = vst.msk [vmem:[%s652_s29 + $0x10] sm:$0xff] %vm370_vm2, %v341_v26  ;;  %v530_v31 = vpop.f32.mrf.mxu1 }
  0xdd   : > { %380 = vst.msk [vmem:[%s652_s29 + $0x40] sm:$0x1] %vm379_vm3, %v365_v29  ;;  %v343_v32 = vpop.f32.mrf.mxu0 }
  0xde   : > { %v344_v33 = vadd.f32 %v343_v32, %v247_v30  ;;  %v367_v34 = vpop.f32.mrf.mxu1 }
  0xdf   : > { %v519_v35 = vpop.f32.mrf.mxu0 }
  0xe0   : > { %374 = vst.msk [vmem:[%s652_s29 + $0x18] sm:$0xff] %vm370_vm2, %v344_v33  ;;  %v531_v37 = vpop.f32.mrf.mxu1 }
  0xe1   : > { %v348_v38 = vpop.f32.mrf.mxu0 }
  0xe2   : > { %v349_v39 = vadd.f32 %v348_v38, %v248_v36 }
  0xe3   : > { %v522_v40 = vpop.f32.mrf.mxu0 }
  0xe4   : > { %375 = vst.msk [vmem:[%s652_s29 + $0x20] sm:$0xff] %vm370_vm2, %v349_v39 }
  0xe5   : > { %v351_v42 = vpop.f32.mrf.mxu0 }
  0xe6   : > { %v352_v43 = vadd.f32 %v351_v42, %v249_v41 }
  0xe7   : > { %v523_v44 = vpop.f32.mrf.mxu0 }
  0xe8   : > { %376 = vst.msk [vmem:[%s652_s29 + $0x28] sm:$0xff] %vm370_vm2, %v352_v43 }
  0xe9 PF: > { %s13_s14 = sadd.s32 1, %s590_s14   ;;  %s705_s12 = smov %s586_s13 }
  0xea   : > { %p10_p5 = scmp.ge.s32.totalorder %s13_s14, 4   ;;  %s706_s13 = smov %s708_s15 }
  0xec   :  { %12 = sbr.rel (!%p10_p5) target bundleno = 2 (0x2), region = 65 }

</bundles_post_ra>
